<compile_context>
chip_gen: v5e
topology: v5e:2x2
jax: 0.10.0
libtpu: 0.0.40
codegen_flags: <defaults>
</compile_context>

<pallas_src>
import jax
import jax.numpy as jnp
from jax.experimental import pallas as pl
from jax.experimental.pallas import tpu as pltpu

H1, H2 = 400, 300          # logical hidden sizes of the Critic
LANE = 128                 # TPU lane width
SUB = 16                   # bf16 sublane packing
H1P = 512                  # H1 padded to a lane multiple
H2P = 384                  # H2 padded to a lane multiple


def _round_up(n, m):
    return ((n + m - 1) // m) * m


# ---------------------------------------------------------------------------
# Kernel: one batch tile per grid step, all weights resident in VMEM.
# ---------------------------------------------------------------------------
def critic_kernel(xu_ref, wa_ref, b1_ref, w2_ref, b2_ref, w3_ref, b3_ref,
                  q_ref):
    # Fused layer-1 MXU pass (K = 128, N = H1P + H2P): columns [0:H1P] of wa
    # hold W1 (acting on the x part of the slab), columns [H1P:] hold W2's
    # u-rows (acting on the u part), so this single dot produces both h1_pre
    # and the u-contribution to layer 2 — no concat, no extra small-K dot.
    y = jnp.dot(xu_ref[...], wa_ref[...], preferred_element_type=jnp.float32)
    h1 = jnp.maximum(y[:, :H1P] + b1_ref[...], 0.0).astype(jnp.bfloat16)
    u_part = y[:, H1P:]                                    # (TM, H2P) f32

    # Layer 2: one K = 512 MXU dot; bias + u-part add + ReLU in f32.
    h2 = jnp.dot(h1, w2_ref[...], preferred_element_type=jnp.float32)
    h2 = jnp.maximum(h2 + u_part + b2_ref[...], 0.0)

    # Layer 3 (300 -> 1): keep it off the MXU — VPU multiply + XLU lane reduce
    # ride otherwise-idle slots.
    q = jnp.sum(h2 * w3_ref[...], axis=-1, keepdims=True)  # (TM, 1) f32

    # Compact (TM, 1) f32 output: ~TM*4 bytes of writeback per tile instead of
    # a 128x-inflated lane-broadcast slab.
    q_ref[...] = q + b3_ref[0, 0]


# ---------------------------------------------------------------------------
# One-time weight staging: pad to lane multiples, fuse W1 with W2's u-rows.
# ---------------------------------------------------------------------------
def stage_params(params, state_dim, action_dim):
    KIN = _round_up(state_dim + action_dim, LANE)   # fused input width (128)

    # Fused layer-1 RHS (KIN, H1P + H2P):
    #   rows [0:state_dim],                    cols [0:H1]        <- W1
    #   rows [state_dim:state_dim+action_dim], cols [H1P:H1P+H2]  <- W2 u-rows
    wa = jnp.zeros((KIN, H1P + H2P), jnp.float32)
    wa = wa.at[:state_dim, :H1].set(params["w1"])
    wa = wa.at[state_dim:state_dim + action_dim,
               H1P:H1P + H2].set(params["w2"][H1:])

    b1 = jnp.zeros((1, H1P), jnp.float32).at[:, :H1].set(params["b1"])

    # Layer-2 weight: only the h1 rows remain (u rows were folded into wa).
    w2 = jnp.zeros((H1P, H2P), jnp.float32).at[:H1, :H2].set(params["w2"][:H1])
    b2 = jnp.zeros((1, H2P), jnp.float32).at[:, :H2].set(params["b2"])

    # Final layer kept as an f32 row for the VPU reduce; b3 as an SMEM scalar.
    w3 = jnp.zeros((1, H2P), jnp.float32).at[:, :H2].set(params["w3"][:, 0])
    b3 = params["b3"].reshape(1, 1).astype(jnp.float32)

    return {"wa": wa.astype(jnp.bfloat16), "b1": b1,
            "w2": w2.astype(jnp.bfloat16), "b2": b2,
            "w3": w3, "b3": b3}


# ---------------------------------------------------------------------------
# Wrapper
# ---------------------------------------------------------------------------
def critic_forward(x, u, staged):
    B, state_dim = x.shape
    action_dim = u.shape[1]
    wa, b1, w2, b2, w3, b3 = (staged["wa"], staged["b1"], staged["w2"],
                              staged["b2"], staged["w3"], staged["b3"])
    KIN = wa.shape[0]

    # Batch tile: whole (16-row-padded) batch for tiny batches; up to 512 rows
    # for training batches, capped so the grid keeps >= 2 steps (v7x megacore).
    if B < 2 * LANE:
        TM = min(_round_up(B, SUB), LANE)
    else:
        half = (_round_up(B, LANE) // 2) // LANE * LANE
        TM = max(LANE, min(512, half))
    BP = _round_up(B, TM)

    # Single combined bf16 input slab: cols [0:sd]=x, [sd:sd+ad]=u, rest zero.
    # TODO(synk): the pad/cast could move fully in-kernel (feed raw f32 x,u and
    # pack into a VMEM scratch) to drop one more HBM round trip per call.
    xu = jnp.zeros((BP, KIN), jnp.bfloat16)
    xu = xu.at[:B, :state_dim].set(x.astype(jnp.bfloat16))
    xu = xu.at[:B, state_dim:state_dim + action_dim].set(u.astype(jnp.bfloat16))

    pinned = lambda shape: pl.BlockSpec(shape, lambda i: (0, 0))  # VMEM-resident

    q_pad = pl.pallas_call(
        critic_kernel,
        out_shape=jax.ShapeDtypeStruct((BP, 1), jnp.float32),
        grid=(BP // TM,),
        in_specs=[
            pl.BlockSpec((TM, KIN), lambda i: (i, 0)),          # batch tile
            pinned(wa.shape), pinned(b1.shape),
            pinned(w2.shape), pinned(b2.shape),
            pinned(w3.shape),
            pl.BlockSpec(memory_space=pltpu.MemorySpace.SMEM),  # scalar b3
        ],
        out_specs=pl.BlockSpec((TM, 1), lambda i: (i, 0)),
        compiler_params=pltpu.CompilerParams(
            dimension_semantics=("parallel",)),   # shard batch tiles across TCs
    )(xu, wa, b1, w2, b2, w3, b3)

    return q_pad[:B]


# ---------------------------------------------------------------------------
# Logical params (PyTorch nn.Linear default init) + references
# ---------------------------------------------------------------------------
def init_params(key, state_dim, action_dim):
    ks = jax.random.split(key, 6)

    def lin(kw, kb, fan_in, fan_out):
        bound = 1.0 / jnp.sqrt(jnp.float32(fan_in))
        w = jax.random.uniform(kw, (fan_in, fan_out), jnp.float32, -bound, bound)
        b = jax.random.uniform(kb, (1, fan_out), jnp.float32, -bound, bound)
        return w, b

    w1, b1 = lin(ks[0], ks[1], state_dim, H1)
    w2, b2 = lin(ks[2], ks[3], H1 + action_dim, H2)
    w3, b3 = lin(ks[4], ks[5], H2, 1)
    return {"w1": w1, "b1": b1, "w2": w2, "b2": b2, "w3": w3, "b3": b3}


def critic_reference(x, u, params):
    # Pure f32 reference matching the PyTorch module.
    h1 = jnp.maximum(x @ params["w1"] + params["b1"], 0.0)
    z = jnp.concatenate([h1, u], axis=1)
    h2 = jnp.maximum(z @ params["w2"] + params["b2"], 0.0)
    return h2 @ params["w3"] + params["b3"]


def critic_reference_staged(x, u, params):
    # Reference that applies the SAME bf16 roundings as the kernel (f32
    # accumulation everywhere) -> only accumulation-order differences remain.
    hp = jax.lax.Precision.HIGHEST
    bf = lambda a: a.astype(jnp.bfloat16).astype(jnp.float32)
    w1, w2x, w2u = params["w1"], params["w2"][:H1], params["w2"][H1:]
    h1 = jnp.maximum(jnp.dot(bf(x), bf(w1), precision=hp) + params["b1"], 0.0)
    uc = jnp.dot(bf(u), bf(w2u), precision=hp)
    h2 = jnp.maximum(jnp.dot(bf(h1), bf(w2x), precision=hp) + uc + params["b2"],
                     0.0)
    return jnp.dot(h2, params["w3"], precision=hp) + params["b3"]


if __name__ == "__main__":
    state_dim, action_dim, batch = 16, 4, 8

    key = jax.random.PRNGKey(0)
    kx, ku, kp = jax.random.split(key, 3)
    x = jax.random.normal(kx, (batch, state_dim), jnp.float32)
    u = jax.random.normal(ku, (batch, action_dim), jnp.float32)

    params = init_params(kp, state_dim, action_dim)
    staged = stage_params(params, state_dim, action_dim)   # pad/fuse/cast once

    q = jax.block_until_ready(critic_forward(x, u, staged))
    assert q.shape == (batch, 1), q.shape

    # Semantic check vs. the f32 module (loose: bf16 weights/activations) ...
    q_f32 = critic_reference(x, u, params)
    assert jnp.allclose(q, q_f32, atol=3e-2, rtol=3e-2), (q, q_f32)

    # ... and a tight check vs. the bf16-staged reference.
    q_bf = critic_reference_staged(x, u, params)
    assert jnp.allclose(q, q_bf, atol=2e-3, rtol=2e-3), (q, q_bf)

    print("KERNEL_OK")
</pallas_src>

<mosaic_0001>
module attributes {stable_mosaic.version = 11 : i64} {
  func.func @critic_kernel(%arg0: i32, %arg1: memref<16x128xbf16, #tpu.memory_space<vmem>>, %arg2: memref<128x896xbf16, #tpu.memory_space<vmem>>, %arg3: memref<1x512xf32, #tpu.memory_space<vmem>>, %arg4: memref<512x384xbf16, #tpu.memory_space<vmem>>, %arg5: memref<1x384xf32, #tpu.memory_space<vmem>>, %arg6: memref<1x384xf32, #tpu.memory_space<vmem>>, %arg7: memref<1x1xf32, #tpu.memory_space<smem>>, %arg8: memref<16x1xf32, #tpu.memory_space<vmem>>) attributes {dimension_semantics = [#tpu.dimension_semantics<parallel>], iteration_bounds = array<i64: 1>, scalar_prefetch = 0 : i64, scratch_operands = 0 : i64, tpu.core_type = #tpu.core_type<tc>, window_params = [{transform_indices = @transform_0, window_bounds = array<i64: 16, 128>}, {pipeline_mode = #tpu.pipeline_mode<synchronous>, transform_indices = @transform_1, window_bounds = array<i64: 128, 896>}, {pipeline_mode = #tpu.pipeline_mode<synchronous>, transform_indices = @transform_2, window_bounds = array<i64: 1, 512>}, {pipeline_mode = #tpu.pipeline_mode<synchronous>, transform_indices = @transform_3, window_bounds = array<i64: 512, 384>}, {pipeline_mode = #tpu.pipeline_mode<synchronous>, transform_indices = @transform_4, window_bounds = array<i64: 1, 384>}, {pipeline_mode = #tpu.pipeline_mode<synchronous>, transform_indices = @transform_5, window_bounds = array<i64: 1, 384>}, {transform_indices = @transform_6, window_bounds = array<i64: 1, 1>}, {transform_indices = @transform_7, window_bounds = array<i64: 16, 1>}]} {
    %c0 = arith.constant 0 : index
    %c0_0 = arith.constant 0 : index
    %0 = vector.load %arg1[%c0, %c0_0] : memref<16x128xbf16, #tpu.memory_space<vmem>>, vector<16x128xbf16>
    %c0_1 = arith.constant 0 : index
    %c0_2 = arith.constant 0 : index
    %1 = vector.load %arg2[%c0_1, %c0_2] : memref<128x896xbf16, #tpu.memory_space<vmem>>, vector<128x896xbf16>
    %cst = arith.constant dense<0.000000e+00> : vector<16x896xf32>
    %2 = tpu.matmul %0, %1, %cst {dimension_numbers = #tpu.dot_dimension_numbers<[1], [0], [0], [1], [0, 0, 1, 1], [], []>} : vector<16x128xbf16>, vector<128x896xbf16>, vector<16x896xf32> -> vector<16x896xf32>
    %3 = vector.extract_strided_slice %2 {offsets = [0, 0], sizes = [16, 512], strides = [1, 1]} : vector<16x896xf32> to vector<16x512xf32>
    %c0_3 = arith.constant 0 : index
    %c0_4 = arith.constant 0 : index
    %4 = vector.load %arg3[%c0_3, %c0_4] : memref<1x512xf32, #tpu.memory_space<vmem>>, vector<1x512xf32>
    %5 = vector.broadcast %4 : vector<1x512xf32> to vector<16x512xf32>
    %6 = arith.addf %3, %5 : vector<16x512xf32>
    %cst_5 = arith.constant 0.000000e+00 : f32
    %7 = vector.broadcast %cst_5 : f32 to vector<16x512xf32>
    %8 = arith.maximumf %6, %7 : vector<16x512xf32>
    %9 = arith.truncf %8 : vector<16x512xf32> to vector<16x512xbf16>
    %10 = vector.extract_strided_slice %2 {offsets = [0, 512], sizes = [16, 384], strides = [1, 1]} : vector<16x896xf32> to vector<16x384xf32>
    %c0_6 = arith.constant 0 : index
    %c0_7 = arith.constant 0 : index
    %11 = vector.load %arg4[%c0_6, %c0_7] : memref<512x384xbf16, #tpu.memory_space<vmem>>, vector<512x384xbf16>
    %cst_8 = arith.constant dense<0.000000e+00> : vector<16x384xf32>
    %12 = tpu.matmul %9, %11, %cst_8 {dimension_numbers = #tpu.dot_dimension_numbers<[1], [0], [0], [1], [0, 0, 1, 1], [], []>} : vector<16x512xbf16>, vector<512x384xbf16>, vector<16x384xf32> -> vector<16x384xf32>
    %13 = arith.addf %12, %10 : vector<16x384xf32>
    %c0_9 = arith.constant 0 : index
    %c0_10 = arith.constant 0 : index
    %14 = vector.load %arg5[%c0_9, %c0_10] : memref<1x384xf32, #tpu.memory_space<vmem>>, vector<1x384xf32>
    %15 = vector.broadcast %14 : vector<1x384xf32> to vector<16x384xf32>
    %16 = arith.addf %13, %15 : vector<16x384xf32>
    %cst_11 = arith.constant 0.000000e+00 : f32
    %17 = vector.broadcast %cst_11 : f32 to vector<16x384xf32>
    %18 = arith.maximumf %16, %17 : vector<16x384xf32>
    %c0_12 = arith.constant 0 : index
    %c0_13 = arith.constant 0 : index
    %19 = vector.load %arg6[%c0_12, %c0_13] : memref<1x384xf32, #tpu.memory_space<vmem>>, vector<1x384xf32>
    %20 = vector.broadcast %19 : vector<1x384xf32> to vector<16x384xf32>
    %21 = arith.mulf %18, %20 : vector<16x384xf32>
    %cst_14 = arith.constant dense<0.000000e+00> : vector<16xf32>
    %22 = vector.multi_reduction <add>, %21, %cst_14 [1] : vector<16x384xf32> to vector<16xf32>
    %23 = vector.shape_cast %22 : vector<16xf32> to vector<16x1xf32>
    %c0_15 = arith.constant 0 : index
    %c0_16 = arith.constant 0 : index
    %24 = memref.load %arg7[%c0_15, %c0_16] : memref<1x1xf32, #tpu.memory_space<smem>>
    %25 = vector.broadcast %24 : f32 to vector<16x1xf32>
    %26 = arith.addf %23, %25 : vector<16x1xf32>
    %c0_17 = arith.constant 0 : index
    %c0_18 = arith.constant 0 : index
    %27 = vector.load %arg8[%c0_17, %c0_18] : memref<16x1xf32, #tpu.memory_space<vmem>>, vector<16x1xf32>
    tpu.vector_store %arg8[%c0_17, %c0_18], %26 {strides = array<i32>} : memref<16x1xf32, #tpu.memory_space<vmem>>, vector<16x1xf32>,
    return
  }
  func.func @transform_0(%arg0: i32) -> (i32, i32) {
    %c0_i32 = arith.constant 0 : i32
    %c0_i32_0 = arith.constant 0 : i32
    return %arg0, %c0_i32 : i32, i32
  }
  func.func @transform_1(%arg0: i32) -> (i32, i32) {
    %c0_i32 = arith.constant 0 : i32
    %c0_i32_0 = arith.constant 0 : i32
    %c0_i32_1 = arith.constant 0 : i32
    return %c0_i32, %c0_i32_0 : i32, i32
  }
  func.func @transform_2(%arg0: i32) -> (i32, i32) {
    %c0_i32 = arith.constant 0 : i32
    %c0_i32_0 = arith.constant 0 : i32
    %c0_i32_1 = arith.constant 0 : i32
    return %c0_i32, %c0_i32_0 : i32, i32
  }
  func.func @transform_3(%arg0: i32) -> (i32, i32) {
    %c0_i32 = arith.constant 0 : i32
    %c0_i32_0 = arith.constant 0 : i32
    %c0_i32_1 = arith.constant 0 : i32
    return %c0_i32, %c0_i32_0 : i32, i32
  }
  func.func @transform_4(%arg0: i32) -> (i32, i32) {
    %c0_i32 = arith.constant 0 : i32
    %c0_i32_0 = arith.constant 0 : i32
    %c0_i32_1 = arith.constant 0 : i32
    return %c0_i32, %c0_i32_0 : i32, i32
  }
  func.func @transform_5(%arg0: i32) -> (i32, i32) {
    %c0_i32 = arith.constant 0 : i32
    %c0_i32_0 = arith.constant 0 : i32
    %c0_i32_1 = arith.constant 0 : i32
    return %c0_i32, %c0_i32_0 : i32, i32
  }
  func.func @transform_6(%arg0: i32) -> (i32, i32) {
    %c0_i32 = arith.constant 0 : i32
    %c0_i32_0 = arith.constant 0 : i32
    %c0_i32_1 = arith.constant 0 : i32
    return %c0_i32, %c0_i32_0 : i32, i32
  }
  func.func @transform_7(%arg0: i32) -> (i32, i32) {
    %c0_i32 = arith.constant 0 : i32
    %c0_i32_0 = arith.constant 0 : i32
    return %arg0, %c0_i32 : i32, i32
  }
}

</mosaic_0001>

<bundles_post_ra>
// kernel: tpu_custom_call.1
= control target key start
LH: loop header
LB: loop body
LE: loop exit
PB: predicated region body
PF: predicated region fallthrough
CT: control target
= control target key end

     0   :  { %13 = vsyncpa [#allocation4], 0  ;;  %s2423_s0 = inlined_call_operand.hbm [shape: bf16[16,128], index: 0, kind: input, shape index: {}]   ;;  %s2424_s1 = inlined_call_operand.hbm [shape: bf16[128,896], index: 1, kind: input, shape index: {}]   ;;  %s2425_s2 = inlined_call_operand.hbm [shape: f32[1,512], index: 2, kind: input, shape index: {}]   ;;  %s2426_s3 = inlined_call_operand.hbm [shape: bf16[512,384], index: 3, kind: input, shape index: {}]   ;;  %s2427_s4 = inlined_call_operand.vmem [shape: f32[1,384], index: 4, kind: input, shape index: {}]   ;;  %s2428_s5 = inlined_call_operand.vmem [shape: f32[1,384], index: 5, kind: input, shape index: {}]   ;;  %s2429_s6 = inlined_call_operand.<no memory space> [shape: f32[1,1], index: 6, kind: input, shape index: {}]   ;;  %s2430_s7 = inlined_call_operand.vmem [shape: f32[16,1], index: 7, kind: output, shape index: {}]  }
   0x1   :  { %14 = vsyncpa [#allocation6], 0  ;;  %s33_s26 = sshll.u32 %s2424_s1, 4  ;;  %s34_s26 = int_to_ptr.hbm [resolvable:$true] %s33_s26 }
   0x2   :  { %15 = vsyncpa [#allocation9], 0  ;;  %s2317_s27 = smov [#allocation5]   ;;  %s20_s8 = sshll.u32 %s2423_s0, 4  ;;  %s21_s8 = int_to_ptr.hbm [resolvable:$true] %s20_s8 }
   0x3   :  { %s35_s28 = sshll.u32 %s2317_s27, 4  ;;  %s2318_s9 = smov 448   ;;  %s36_s28 = int_to_ptr.vmem [resolvable:$true] %s35_s28 }
   0x4   :  { %s2319_s10 = smov 28   ;;  %s2320_s11 = smov [#allocation3]  }
   0x5   :  { %41 = dma.hbm_to_vmem [thread:$0]  %s34_s26, 7168, %s36_s28, [#allocation6], %s2318_s9, %s2318_s9, %s2319_s10  }
   0x6   :  { %s22_s12 = sshll.u32 %s2320_s11, 4  ;;  %s2321_s13 = smov 64   ;;  %s23_s12 = int_to_ptr.vmem [resolvable:$true] %s22_s12 }
   0x7   :  { %s2322_s14 = smov 4   ;;  %s47_s16 = sshll.u32 %s2425_s2, 4  ;;  %s48_s16 = int_to_ptr.hbm [resolvable:$true] %s47_s16 }
   0x8   :  { %28 = dma.hbm_to_vmem [thread:$0]  %s21_s8, 128, %s23_s12, [#allocation4], %s2321_s13, %s2321_s13, %s2322_s14  }
   0x9   :  { %s2323_s17 = smov [#allocation7]   ;;  %s57_s20 = sshll.u32 %s2426_s3, 4  ;;  %s58_s20 = int_to_ptr.hbm [resolvable:$true] %s57_s20 }
   0xa   :  { %s49_s18 = sshll.u32 %s2323_s17, 4  ;;  %s2324_s21 = smov [#allocation8]   ;;  %s50_s18 = int_to_ptr.vmem [resolvable:$true] %s49_s18 }
   0xb   :  { %52 = dma.hbm_to_vmem [thread:$0]  %s48_s16, 64, %s50_s18, [#allocation6]  }
   0xc   :  { %s59_s22 = sshll.u32 %s2324_s21, 4  ;;  %s2325_s23 = smov 192   ;;  %s60_s22 = int_to_ptr.vmem [resolvable:$true] %s59_s22 }
   0xd   :  { %s2326_s24 = smov 12  }
   0xe   :  { %65 = dma.hbm_to_vmem [thread:$0]  %s58_s20, 12288, %s60_s22, [#allocation9], %s2325_s23, %s2325_s23, %s2326_s24  }
   0xf   :  { %2311 = dma.done.wait [#allocation4], 128  }
  0x10   :  { %2312 = vsyncadd [#allocation4], 4294967168 }
  0x11   :  { %2313 = dma.done.wait [#allocation6], 7232  }
  0x12   :  { %2314 = vsyncadd [#allocation6], 4294960064 }
  0x13   :  { %2315 = dma.done.wait [#allocation9], 12288  }
  0x14   :  { %2316 = vsyncadd [#allocation9], 4294955008  ;;  %v1642_v0 = vld [vmem:[#allocation5 + $0x188] sm:$0xf]  ;;  %v2105_v1 = vld [vmem:[#allocation5 + $0x1a0] sm:$0xf0] }
  0x15   :  { %v2102_v2 = vld [vmem:[#allocation5 + $0x18c] sm:$0xf]  ;;  %v1643_v3 = vor.u32 %v2105_v1, %v1642_v0  ;;  %v1644_v4 = vld [vmem:[#allocation5 + $0x1a4] sm:$0xf0]  ;;  %v1650_v5 = vld [vmem:[#allocation5 + $0x190] sm:$0xf] }
  0x16   :  { %v2106_v6 = vld [vmem:[#allocation5 + $0x1a8] sm:$0xf0]  ;;  %v1647_v7 = vor.u32 %v2102_v2, %v1644_v4  ;;  %v2103_v9 = vld [vmem:[#allocation5 + $0x194] sm:$0xf]  ;;  %v1652_v10 = vld [vmem:[#allocation5 + $0x1ac] sm:$0xf0] }
  0x17   :  { %v1651_v8 = vor.u32 %v2106_v6, %v1650_v5  ;;  %v1614_v11 = vld [vmem:[#allocation5 + $0x150] sm:$0xf]  ;;  %448 = vmatpush.bf16.msra.mxu0 %v1643_v3  ;;  %v1655_v12 = vor.u32 %v2103_v9, %v1652_v10  ;;  %v2098_v13 = vld [vmem:[#allocation5 + $0x168] sm:$0xf0]  ;;  %v2095_v14 = vld [vmem:[#allocation5 + $0x154] sm:$0xf] }
  0x18   :  { %v1616_v15 = vld [vmem:[#allocation5 + $0x16c] sm:$0xf0]  ;;  %462 = vmatpush.bf16.msra.mxu1 %v1647_v7  ;;  %v1615_v16 = vor.u32 %v2098_v13, %v1614_v11  ;;  %v1622_v18 = vld [vmem:[#allocation5 + $0x158] sm:$0xf]  ;;  %v2099_v19 = vld [vmem:[#allocation5 + $0x170] sm:$0xf0] }
  0x19   :  { %476 = vmatpush.bf16.msra.mxu2 %v1651_v8  ;;  %v1619_v17 = vor.u32 %v2095_v14, %v1616_v15  ;;  %v2096_v20 = vld [vmem:[#allocation5 + $0x15c] sm:$0xf]  ;;  %490 = vmatpush.bf16.msra.mxu3 %v1655_v12  ;;  %v1623_v21 = vor.u32 %v2099_v19, %v1622_v18  ;;  %v1624_v22 = vld [vmem:[#allocation5 + $0x174] sm:$0xf0]  ;;  %v2091_v24 = vld [vmem:[#allocation5 + $0x130] sm:$0xf0] }
  0x1a   :  { %v1586_v23 = vld [vmem:[#allocation5 + $0x118] sm:$0xf]  ;;  %v1627_v25 = vor.u32 %v2096_v20, %v1624_v22  ;;  %v2088_v26 = vld [vmem:[#allocation5 + $0x11c] sm:$0xf]  ;;  %v1594_v28 = vld [vmem:[#allocation5 + $0x120] sm:$0xf] }
  0x1b   :  { %v1588_v27 = vld [vmem:[#allocation5 + $0x134] sm:$0xf0]  ;;  %449 = vmatpush.bf16.msra.mxu0 %v1615_v16  ;;  %v1587_v29 = vor.u32 %v2091_v24, %v1586_v23  ;;  %v2092_v30 = vld [vmem:[#allocation5 + $0x138] sm:$0xf0]  ;;  %v2089_v31 = vld [vmem:[#allocation5 + $0x124] sm:$0xf] }
  0x1c   :  { %v1596_v32 = vld [vmem:[#allocation5 + $0x13c] sm:$0xf0]  ;;  %463 = vmatpush.bf16.msra.mxu1 %v1619_v17  ;;  %v1591_v33 = vor.u32 %v2088_v26, %v1588_v27  ;;  %v1595_v34 = vor.u32 %v2092_v30, %v1594_v28  ;;  %v2084_v36 = vld [vmem:[#allocation5 + $0xf8] sm:$0xf0]  ;;  %v2081_v37 = vld [vmem:[#allocation5 + $0xe4] sm:$0xf] }
  0x1d   :  { %477 = vmatpush.bf16.msra.mxu2 %v1623_v21  ;;  %v1558_v35 = vld [vmem:[#allocation5 + $0xe0] sm:$0xf]  ;;  %491 = vmatpush.bf16.msra.mxu3 %v1627_v25  ;;  %v1599_v38 = vor.u32 %v2089_v31, %v1596_v32  ;;  %v1566_v40 = vld [vmem:[#allocation5 + $0xe8] sm:$0xf]  ;;  %v2085_v41 = vld [vmem:[#allocation5 + $0x100] sm:$0xf0] }
  0x1e   :  { %v1560_v39 = vld [vmem:[#allocation5 + $0xfc] sm:$0xf0]  ;;  %v2082_v42 = vld [vmem:[#allocation5 + $0xec] sm:$0xf]  ;;  %v1568_v43 = vld [vmem:[#allocation5 + $0x104] sm:$0xf0]  ;;  %v1559_v44 = vor.u32 %v2084_v36, %v1558_v35  ;;  %v1567_v46 = vor.u32 %v2085_v41, %v1566_v40 }
  0x1f   :  { %450 = vmatpush.bf16.msra.mxu0 %v1587_v29  ;;  %v1563_v45 = vor.u32 %v2081_v37, %v1560_v39  ;;  %v1530_v47 = vld [vmem:[#allocation5 + $0xa8] sm:$0xf]  ;;  %v2077_v48 = vld [vmem:[#allocation5 + $0xc0] sm:$0xf0]  ;;  %v2074_v49 = vld [vmem:[#allocation5 + $0xac] sm:$0xf]  ;;  %v1571_v50 = vor.u32 %v2082_v42, %v1568_v43 }
  0x20   :  { %464 = vmatpush.bf16.msra.mxu1 %v1591_v33  ;;  %v1532_v51 = vld [vmem:[#allocation5 + $0xc4] sm:$0xf0]  ;;  %v1538_v52 = vld [vmem:[#allocation5 + $0xb0] sm:$0xf]  ;;  %v2078_v53 = vld [vmem:[#allocation5 + $0xc8] sm:$0xf0]  ;;  %v1531_v56 = vor.u32 %v2077_v48, %v1530_v47 }
  0x21   :  { %478 = vmatpush.bf16.msra.mxu2 %v1595_v34  ;;  %492 = vmatpush.bf16.msra.mxu3 %v1599_v38  ;;  %v2075_v54 = vld [vmem:[#allocation5 + $0xb4] sm:$0xf]  ;;  %v1540_v55 = vld [vmem:[#allocation5 + $0xcc] sm:$0xf0]  ;;  %v1535_v57 = vor.u32 %v2074_v49, %v1532_v51  ;;  %v1539_v58 = vor.u32 %v2078_v53, %v1538_v52  ;;  %v2070_v60 = vld [vmem:[#allocation5 + $0x88] sm:$0xf0] }
  0x22   :  { %v1502_v59 = vld [vmem:[#allocation5 + $0x70] sm:$0xf]  ;;  %v2067_v61 = vld [vmem:[#allocation5 + $0x74] sm:$0xf]  ;;  %v1543_v62 = vor.u32 %v2075_v54, %v1540_v55  ;;  %v1510_v0 = vld [vmem:[#allocation5 + $0x78] sm:$0xf] }
  0x23   :  { %451 = vmatpush.bf16.msra.mxu0 %v1559_v44  ;;  %v1504_v63 = vld [vmem:[#allocation5 + $0x8c] sm:$0xf0]  ;;  %v2071_v1 = vld [vmem:[#allocation5 + $0x90] sm:$0xf0]  ;;  %v2068_v2 = vld [vmem:[#allocation5 + $0x7c] sm:$0xf]  ;;  %v1503_v4 = vor.u32 %v2070_v60, %v1502_v59 }
  0x24   :  { %465 = vmatpush.bf16.msra.mxu1 %v1563_v45  ;;  %v1512_v3 = vld [vmem:[#allocation5 + $0x94] sm:$0xf0]  ;;  %v1507_v5 = vor.u32 %v2067_v61, %v1504_v63  ;;  %v1511_v6 = vor.u32 %v2071_v1, %v1510_v0  ;;  %v2063_v8 = vld [vmem:[#allocation5 + $0x50] sm:$0xf0]  ;;  %v2060_v9 = vld [vmem:[#allocation5 + $0x3c] sm:$0xf] }
  0x25   :  { %479 = vmatpush.bf16.msra.mxu2 %v1567_v46  ;;  %493 = vmatpush.bf16.msra.mxu3 %v1571_v50  ;;  %v1474_v7 = vld [vmem:[#allocation5 + $0x38] sm:$0xf]  ;;  %v1515_v10 = vor.u32 %v2068_v2, %v1512_v3  ;;  %v1482_v12 = vld [vmem:[#allocation5 + $0x40] sm:$0xf]  ;;  %v2064_v13 = vld [vmem:[#allocation5 + $0x58] sm:$0xf0] }
  0x26   :  { %v1476_v11 = vld [vmem:[#allocation5 + $0x54] sm:$0xf0]  ;;  %v2061_v14 = vld [vmem:[#allocation5 + $0x44] sm:$0xf]  ;;  %v1484_v15 = vld [vmem:[#allocation5 + $0x5c] sm:$0xf0]  ;;  %v1475_v16 = vor.u32 %v2063_v8, %v1474_v7  ;;  %v1483_v19 = vor.u32 %v2064_v13, %v1482_v12 }
  0x27   :  { %452 = vmatpush.bf16.msra.mxu0 %v1531_v56  ;;  %v1446_v17 = vld [vmem:[#allocation5] sm:$0xf]  ;;  %v1479_v18 = vor.u32 %v2060_v9, %v1476_v11  ;;  %v2056_v20 = vld [vmem:[#allocation5 + $0x18] sm:$0xf0]  ;;  %v2053_v21 = vld [vmem:[#allocation5 + $0x4] sm:$0xf]  ;;  %v1487_v23 = vor.u32 %v2061_v14, %v1484_v15 }
  0x28   :  { %466 = vmatpush.bf16.msra.mxu1 %v1535_v57  ;;  %v1448_v22 = vld [vmem:[#allocation5 + $0x1c] sm:$0xf0]  ;;  %v1454_v24 = vld [vmem:[#allocation5 + $0x8] sm:$0xf]  ;;  %v2057_v25 = vld [vmem:[#allocation5 + $0x20] sm:$0xf0]  ;;  %v1447_v30 = vor.u32 %v2056_v20, %v1446_v17 }
  0x29   :  { %480 = vmatpush.bf16.msra.mxu2 %v1539_v58  ;;  %494 = vmatpush.bf16.msra.mxu3 %v1543_v62  ;;  %v2054_v26 = vld [vmem:[#allocation5 + $0xc] sm:$0xf]  ;;  %v1456_v27 = vld [vmem:[#allocation5 + $0x24] sm:$0xf0]  ;;  %v1658_v28 = vld [vmem:[#allocation5 + $0x198] sm:$0xf]  ;;  %v1451_v33 = vor.u32 %v2053_v21, %v1448_v22  ;;  %v1455_v34 = vor.u32 %v2057_v25, %v1454_v24 }
  0x2a   :  { %v2107_v29 = vld [vmem:[#allocation5 + $0x1b0] sm:$0xf0]  ;;  %v2104_v31 = vld [vmem:[#allocation5 + $0x19c] sm:$0xf]  ;;  %v1660_v32 = vld [vmem:[#allocation5 + $0x1b4] sm:$0xf0]  ;;  %v1459_v35 = vor.u32 %v2054_v26, %v1456_v27 }
  0x2b   :  { %453 = vmatpush.bf16.msra.mxu0 %v1503_v4  ;;  %v1659_v36 = vor.u32 %v2107_v29, %v1658_v28  ;;  %v1666_v37 = vld [vmem:[#allocation5 + $0x1a0] sm:$0xf]  ;;  %v2108_v38 = vld [vmem:[#allocation5 + $0x1b8] sm:$0xf0]  ;;  %v1663_v42 = vor.u32 %v2104_v31, %v1660_v32  ;;  %v2097_v43 = vld [vmem:[#allocation5 + $0x164] sm:$0xf] }
  0x2c   :  { %467 = vmatpush.bf16.msra.mxu1 %v1507_v5  ;;  %v2379_v39 = vld [vmem:[#allocation3] sm:$0xff]  ;;  %v1630_v40 = vld [vmem:[#allocation5 + $0x160] sm:$0xf]  ;;  %v1667_v45 = vor.u32 %v2108_v38, %v1666_v37  ;;  %v1638_v47 = vld [vmem:[#allocation5 + $0x168] sm:$0xf]  ;;  %vm1430_vm0 = vcmask 7168  }
  0x2d   :  { %481 = vmatpush.bf16.msra.mxu2 %v1511_v6  ;;  %495 = vmatpush.bf16.msra.mxu3 %v1515_v10  ;;  %v2100_v41 = vld [vmem:[#allocation5 + $0x178] sm:$0xf0]  ;;  %v1632_v44 = vld [vmem:[#allocation5 + $0x17c] sm:$0xf0]  ;;  %v2101_v48 = vld [vmem:[#allocation5 + $0x180] sm:$0xf0] }
  0x2e   :  { %v1631_v46 = vor.u32 %v2100_v41, %v1630_v40  ;;  %v1602_v49 = vld [vmem:[#allocation5 + $0x128] sm:$0xf]  ;;  %v2093_v50 = vld [vmem:[#allocation5 + $0x140] sm:$0xf0]  ;;  %v1635_v51 = vor.u32 %v2097_v43, %v1632_v44  ;;  %v2090_v52 = vld [vmem:[#allocation5 + $0x12c] sm:$0xf]  ;;  %v1639_v56 = vor.u32 %v2101_v48, %v1638_v47 }
  0x2f   :  { %454 = vmatpush.bf16.msra.mxu0 %v1475_v16  ;;  %v1604_v53 = vld [vmem:[#allocation5 + $0x144] sm:$0xf0]  ;;  %v1754_v54 = vld [vmem:[#allocation8 + $0xa8] sm:$0xf]  ;;  %v2131_v55 = vld [vmem:[#allocation8 + $0xb0] sm:$0xf0]  ;;  %v1603_v58 = vor.u32 %v2093_v50, %v1602_v49 }
  0x30   :  { %468 = vmatpush.bf16.msra.mxu1 %v1479_v18  ;;  %v1755_v57 = vor.u32 %v2131_v55, %v1754_v54  ;;  %v1610_v59 = vld [vmem:[#allocation5 + $0x130] sm:$0xf]  ;;  %v2094_v60 = vld [vmem:[#allocation5 + $0x148] sm:$0xf0]  ;;  %v1742_v61 = vld [vmem:[#allocation8 + $0x90] sm:$0xf]  ;;  %v1607_v0 = vor.u32 %v2090_v52, %v1604_v53 }
  0x31   :  { %482 = vmatpush.bf16.msra.mxu2 %v1483_v19  ;;  %496 = vmatpush.bf16.msra.mxu3 %v1487_v23  ;;  %v1574_v62 = vld [vmem:[#allocation5 + $0xf0] sm:$0xf]  ;;  %v2086_v63 = vld [vmem:[#allocation5 + $0x108] sm:$0xf0]  ;;  %v2128_v1 = vld [vmem:[#allocation8 + $0x98] sm:$0xf0]  ;;  %v1611_v5 = vor.u32 %v2094_v60, %v1610_v59 }
  0x32   :  { %v2083_v2 = vld [vmem:[#allocation5 + $0xf4] sm:$0xf]  ;;  %v1576_v3 = vld [vmem:[#allocation5 + $0x10c] sm:$0xf0]  ;;  %v1743_v4 = vor.u32 %v2128_v1, %v1742_v61  ;;  %v1575_v6 = vor.u32 %v2086_v63, %v1574_v62  ;;  %v1582_v7 = vld [vmem:[#allocation5 + $0xf8] sm:$0xf] }
  0x33   :  { %455 = vmatpush.bf16.msra.mxu0 %v1447_v30  ;;  %v2087_v8 = vld [vmem:[#allocation5 + $0x110] sm:$0xf0]  ;;  %v1730_v9 = vld [vmem:[#allocation8 + $0x78] sm:$0xf]  ;;  %v1546_v10 = vld [vmem:[#allocation5 + $0xb8] sm:$0xf]  ;;  %v1579_v12 = vor.u32 %v2083_v2, %v1576_v3 }
  0x34   :  { %469 = vmatpush.bf16.msra.mxu1 %v1451_v33  ;;  %v2079_v11 = vld [vmem:[#allocation5 + $0xd0] sm:$0xf0]  ;;  %v2125_v13 = vld [vmem:[#allocation8 + $0x80] sm:$0xf0]  ;;  %v2076_v14 = vld [vmem:[#allocation5 + $0xbc] sm:$0xf]  ;;  %v1583_v17 = vor.u32 %v2087_v8, %v1582_v7 }
  0x35   :  { %483 = vmatpush.bf16.msra.mxu2 %v1455_v34  ;;  %497 = vmatpush.bf16.msra.mxu3 %v1459_v35  ;;  %v1548_v15 = vld [vmem:[#allocation5 + $0xd4] sm:$0xf0]  ;;  %v1731_v16 = vor.u32 %v2125_v13, %v1730_v9  ;;  %v1718_v18 = vld [vmem:[#allocation8 + $0x60] sm:$0xf]  ;;  %v2122_v19 = vld [vmem:[#allocation8 + $0x68] sm:$0xf0]  ;;  %v1547_v20 = vor.u32 %v2079_v11, %v1546_v10 }
  0x36   :  { %456 = vmatmul.bf16.vlgmr.msra.gmra.mxu0 %v2379_v39  ;;  %v1554_v21 = vld [vmem:[#allocation5 + $0xc0] sm:$0xf]  ;;  %v2080_v22 = vld [vmem:[#allocation5 + $0xd8] sm:$0xf0]  ;;  %v1551_v25 = vor.u32 %v2076_v14, %v1548_v15  ;;  %v2069_v26 = vld [vmem:[#allocation5 + $0x84] sm:$0xf]  ;;  %v1719_v27 = vor.u32 %v2122_v19, %v1718_v18 }
  0x37   :  { %504 = vmatpush.bf16.msrb.mxu0 %v1659_v36  ;;  %470 = vmatmul.bf16.vlgmr.msra.gmra.mxu1 %v2379_v39  ;;  %v1518_v23 = vld [vmem:[#allocation5 + $0x80] sm:$0xf]  ;;  %v2072_v24 = vld [vmem:[#allocation5 + $0x98] sm:$0xf0]  ;;  %v1706_v29 = vld [vmem:[#allocation8 + $0x48] sm:$0xf]  ;;  %v1555_v31 = vor.u32 %v2080_v22, %v1554_v21 }
  0x38   :  { %518 = vmatpush.bf16.msrb.mxu1 %v1663_v42  ;;  %484 = vmatmul.bf16.vlgmr.msra.gmra.mxu2 %v2379_v39  ;;  %v1520_v28 = vld [vmem:[#allocation5 + $0x9c] sm:$0xf0]  ;;  %v2119_v30 = vld [vmem:[#allocation8 + $0x50] sm:$0xf0]  ;;  %v1519_v32 = vor.u32 %v2072_v24, %v1518_v23  ;;  %v1526_v33 = vld [vmem:[#allocation5 + $0x88] sm:$0xf] }
  0x39   :  { %498 = vmatmul.bf16.vlgmr.msra.gmra.mxu3 %v2379_v39  ;;  %532 = vmatpush.bf16.msrb.mxu2 %v1667_v45  ;;  %v2073_v34 = vld [vmem:[#allocation5 + $0xa0] sm:$0xf0]  ;;  %v1490_v35 = vld [vmem:[#allocation5 + $0x48] sm:$0xf]  ;;  %v1523_v37 = vor.u32 %v2069_v26, %v1520_v28  ;;  %v2062_v38 = vld [vmem:[#allocation5 + $0x4c] sm:$0xf]  ;;  %v1707_v40 = vor.u32 %v2119_v30, %v1706_v29 }
  0x3a   :  { %1216 = vmatpush.bf16.msrb.mxu3 %v1755_v57  ;;  %v2065_v36 = vld [vmem:[#allocation5 + $0x60] sm:$0xf0]  ;;  %v1492_v41 = vld [vmem:[#allocation5 + $0x64] sm:$0xf0]  ;;  %v1694_v42 = vld [vmem:[#allocation8 + $0x30] sm:$0xf]  ;;  %v1527_v44 = vor.u32 %v2073_v34, %v1526_v33 }
  0x3b   :  { %505 = vmatpush.bf16.msrb.mxu0 %v1631_v46  ;;  %v2116_v43 = vld [vmem:[#allocation8 + $0x38] sm:$0xf0]  ;;  %v1491_v45 = vor.u32 %v2065_v36, %v1490_v35  ;;  %v1462_v46 = vld [vmem:[#allocation5 + $0x10] sm:$0xf]  ;;  %v2066_v48 = vld [vmem:[#allocation5 + $0x68] sm:$0xf0]  ;;  %v1495_v52 = vor.u32 %v2062_v38, %v1492_v41 }
  0x3c   :  { %519 = vmatpush.bf16.msrb.mxu1 %v1635_v51  ;;  %v1498_v47 = vld [vmem:[#allocation5 + $0x50] sm:$0xf]  ;;  %v2058_v49 = vld [vmem:[#allocation5 + $0x28] sm:$0xf0]  ;;  %v2155_v51 = vld [vmem:[#allocation8 + $0x170] sm:$0xf0]  ;;  %v1695_v53 = vor.u32 %v2116_v43, %v1694_v42 }
  0x3d   :  { %533 = vmatpush.bf16.msrb.mxu2 %v1639_v56  ;;  %v1850_v50 = vld [vmem:[#allocation8 + $0x168] sm:$0xf]  ;;  %v2055_v54 = vld [vmem:[#allocation5 + $0x14] sm:$0xf]  ;;  %v1464_v55 = vld [vmem:[#allocation5 + $0x2c] sm:$0xf0]  ;;  %v1499_v57 = vor.u32 %v2066_v48, %v1498_v47  ;;  %v1463_v61 = vor.u32 %v2058_v49, %v1462_v46 }
  0x3e   :  { %1217 = vmatpush.bf16.msrb.mxu3 %v1743_v4  ;;  %v1946_v56 = vld [vmem:[#allocation8 + $0x228] sm:$0xf]  ;;  %v1682_v59 = vld [vmem:[#allocation8 + $0x18] sm:$0xf]  ;;  %v2113_v60 = vld [vmem:[#allocation8 + $0x20] sm:$0xf0]  ;;  %v1467_v1 = vor.u32 %v2055_v54, %v1464_v55 }
  0x3f   :  { %506 = vmatpush.bf16.msrb.mxu0 %v1603_v58  ;;  %v2179_v58 = vld [vmem:[#allocation8 + $0x230] sm:$0xf0]  ;;  %v2059_v63 = vld [vmem:[#allocation5 + $0x30] sm:$0xf0]  ;;  %v2042_v2 = vld [vmem:[#allocation8 + $0x2e8] sm:$0xf]  ;;  %v1683_v7 = vor.u32 %v2113_v60, %v1682_v59 }
  0x40   :  { %520 = vmatpush.bf16.msrb.mxu1 %v1607_v0  ;;  %v1470_v62 = vld [vmem:[#allocation5 + $0x18] sm:$0xf]  ;;  %v1851_v0 = vor.u32 %v2155_v51, %v1850_v50  ;;  %v1838_v4 = vld [vmem:[#allocation8 + $0x150] sm:$0xf]  ;;  %v2176_v10 = vld [vmem:[#allocation8 + $0x218] sm:$0xf0] }
  0x41   :  { %534 = vmatpush.bf16.msrb.mxu2 %v1611_v5  ;;  %v2203_v3 = vld [vmem:[#allocation8 + $0x2f0] sm:$0xf0]  ;;  %v2152_v5 = vld [vmem:[#allocation8 + $0x158] sm:$0xf0]  ;;  %v1471_v8 = vor.u32 %v2059_v63, %v1470_v62  ;;  %v1934_v9 = vld [vmem:[#allocation8 + $0x210] sm:$0xf] }
  0x42   :  { %1218 = vmatpush.bf16.msrb.mxu3 %v1731_v16  ;;  %v2043_v11 = vor.u32 %v2203_v3, %v2042_v2  ;;  %v1670_v13 = vld [vmem:[#allocation8] sm:$0xf]  ;;  %v2110_v14 = vld [vmem:[#allocation8 + $0x8] sm:$0xf0]  ;;  %v1839_v15 = vor.u32 %v2152_v5, %v1838_v4  ;;  %v2200_v16 = vld [vmem:[#allocation8 + $0x2d8] sm:$0xf0]  ;;  %v1935_v21 = vor.u32 %v2176_v10, %v1934_v9 }
  0x43   :  { %507 = vmatpush.bf16.msrb.mxu0 %v1575_v6  ;;  %v1947_v6 = vor.u32 %v2179_v58, %v1946_v56  ;;  %v1756_v18 = vld [vmem:[#allocation8 + $0xb4] sm:$0xf0]  ;;  %v2173_v23 = vld [vmem:[#allocation8 + $0x200] sm:$0xf0]  ;;  %v1671_v24 = vor.u32 %v2110_v14, %v1670_v13  ;;  %v2127_v30 = vld [vmem:[#allocation8 + $0x94] sm:$0xf] }
  0x44   :  { %521 = vmatpush.bf16.msrb.mxu1 %v1579_v12  ;;  %v2030_v12 = vld [vmem:[#allocation8 + $0x2d0] sm:$0xf]  ;;  %v1826_v19 = vld [vmem:[#allocation8 + $0x138] sm:$0xf]  ;;  %v2197_v29 = vld [vmem:[#allocation8 + $0x2c0] sm:$0xf0] }
  0x45   :  { %535 = vmatpush.bf16.msrb.mxu2 %v1583_v17  ;;  %v2130_v17 = vld [vmem:[#allocation8 + $0xac] sm:$0xf]  ;;  %v1922_v22 = vld [vmem:[#allocation8 + $0x1f8] sm:$0xf]  ;;  %v1910_v35 = vld [vmem:[#allocation8 + $0x1e0] sm:$0xf] }
  0x46   :  { %1219 = vmatpush.bf16.msrb.mxu3 %v1719_v27  ;;  %v2018_v26 = vld [vmem:[#allocation8 + $0x2b8] sm:$0xf]  ;;  %v1759_v27 = vor.u32 %v2130_v17, %v1756_v18  ;;  %v2146_v33 = vld [vmem:[#allocation8 + $0x128] sm:$0xf0]  ;;  %v1923_v34 = vor.u32 %v2173_v23, %v1922_v22  ;;  %v2006_v38 = vld [vmem:[#allocation8 + $0x2a0] sm:$0xf] }
  0x47   :  { %508 = vmatpush.bf16.msrb.mxu0 %v1547_v20  ;;  %v2149_v20 = vld [vmem:[#allocation8 + $0x140] sm:$0xf0]  ;;  %v2170_v36 = vld [vmem:[#allocation8 + $0x1e8] sm:$0xf0]  ;;  %v2124_v43 = vld [vmem:[#allocation8 + $0x7c] sm:$0xf] }
  0x48   :  { %522 = vmatpush.bf16.msrb.mxu1 %v1551_v25  ;;  %v2031_v25 = vor.u32 %v2200_v16, %v2030_v12  ;;  %v1827_v28 = vor.u32 %v2149_v20, %v1826_v19  ;;  %v2194_v42 = vld [vmem:[#allocation8 + $0x2a8] sm:$0xf0]  ;;  %v2143_v46 = vld [vmem:[#allocation8 + $0x110] sm:$0xf0]  ;;  %v1911_v47 = vor.u32 %v2170_v36, %v1910_v35  ;;  %v1898_v48 = vld [vmem:[#allocation8 + $0x1c8] sm:$0xf] }
  0x49   :  { %536 = vmatpush.bf16.msrb.mxu2 %v1555_v31  ;;  %v1744_v31 = vld [vmem:[#allocation8 + $0x9c] sm:$0xf0]  ;;  %v2167_v49 = vld [vmem:[#allocation8 + $0x1d0] sm:$0xf0]  ;;  %v1994_v50 = vld [vmem:[#allocation8 + $0x288] sm:$0xf] }
  0x4a   :  { %1220 = vmatpush.bf16.msrb.mxu3 %v1707_v40  ;;  %v1747_v40 = vor.u32 %v2127_v30, %v1744_v31  ;;  %v2121_v54 = vld [vmem:[#allocation8 + $0x64] sm:$0xf]  ;;  %v1720_v55 = vld [vmem:[#allocation8 + $0x6c] sm:$0xf0]  ;;  %v1899_v58 = vor.u32 %v2167_v49, %v1898_v48  ;;  %v2164_v60 = vld [vmem:[#allocation8 + $0x1b8] sm:$0xf0] }
  0x4b   :  { %509 = vmatpush.bf16.msrb.mxu0 %v1519_v32  ;;  %v1814_v32 = vld [vmem:[#allocation8 + $0x120] sm:$0xf]  ;;  %v1790_v56 = vld [vmem:[#allocation8 + $0xf0] sm:$0xf]  ;;  %v1723_v62 = vor.u32 %v2121_v54, %v1720_v55  ;;  %v1778_v2 = vld [vmem:[#allocation8 + $0xd8] sm:$0xf] }
  0x4c   :  { %523 = vmatpush.bf16.msrb.mxu1 %v1523_v37  ;;  %v2019_v37 = vor.u32 %v2197_v29, %v2018_v26  ;;  %v1815_v41 = vor.u32 %v2146_v33, %v1814_v32  ;;  %v1886_v59 = vld [vmem:[#allocation8 + $0x1b0] sm:$0xf]  ;;  %v2137_v3 = vld [vmem:[#allocation8 + $0xe0] sm:$0xf0]  ;;  %v1874_v5 = vld [vmem:[#allocation8 + $0x198] sm:$0xf] }
  0x4d   :  { %537 = vmatpush.bf16.msrb.mxu2 %v1527_v44  ;;  %v1732_v44 = vld [vmem:[#allocation8 + $0x84] sm:$0xf0]  ;;  %v1887_v4 = vor.u32 %v2164_v60, %v1886_v59  ;;  %v1970_v9 = vld [vmem:[#allocation8 + $0x258] sm:$0xf]  ;;  %v2185_v10 = vld [vmem:[#allocation8 + $0x260] sm:$0xf0] }
  0x4e   :  { %1221 = vmatpush.bf16.msrb.mxu3 %v1695_v53  ;;  %v1735_v51 = vor.u32 %v2124_v43, %v1732_v44  ;;  %v2191_v53 = vld [vmem:[#allocation8 + $0x290] sm:$0xf0]  ;;  %v2134_v12 = vld [vmem:[#allocation8 + $0xc8] sm:$0xf0]  ;;  %v1862_v16 = vld [vmem:[#allocation8 + $0x180] sm:$0xf]  ;;  %v1971_v18 = vor.u32 %v2185_v10, %v1970_v9 }
  0x4f   :  { %510 = vmatpush.bf16.msrb.mxu0 %v1491_v45  ;;  %v1802_v45 = vld [vmem:[#allocation8 + $0x108] sm:$0xf]  ;;  %v2154_v13 = vld [vmem:[#allocation8 + $0x16c] sm:$0xf]  ;;  %v1948_v20 = vld [vmem:[#allocation8 + $0x234] sm:$0xf0] }
  0x50   :  { %524 = vmatpush.bf16.msrb.mxu1 %v1495_v52  ;;  %v1803_v52 = vor.u32 %v2143_v46, %v1802_v45  ;;  %v2158_v17 = vld [vmem:[#allocation8 + $0x188] sm:$0xf0]  ;;  %v1958_v22 = vld [vmem:[#allocation8 + $0x240] sm:$0xf]  ;;  %v2175_v32 = vld [vmem:[#allocation8 + $0x214] sm:$0xf] }
  0x51   :  { %538 = vmatpush.bf16.msrb.mxu2 %v1499_v57  ;;  %v2140_v57 = vld [vmem:[#allocation8 + $0xf8] sm:$0xf0]  ;;  %v2178_v19 = vld [vmem:[#allocation8 + $0x22c] sm:$0xf]  ;;  %v1840_v29 = vld [vmem:[#allocation8 + $0x15c] sm:$0xf0] }
  0x52   :  { %1222 = vmatpush.bf16.msrb.mxu3 %v1683_v7  ;;  %v1791_v63 = vor.u32 %v2140_v57, %v1790_v56  ;;  %v2182_v23 = vld [vmem:[#allocation8 + $0x248] sm:$0xf0]  ;;  %v1951_v30 = vor.u32 %v2178_v19, %v1948_v20  ;;  %v1936_v33 = vld [vmem:[#allocation8 + $0x21c] sm:$0xf0]  ;;  %v2199_v36 = vld [vmem:[#allocation8 + $0x2d4] sm:$0xf] }
  0x53   :  { %511 = vmatpush.bf16.msrb.mxu0 %v1463_v61  ;;  %v1995_v61 = vor.u32 %v2191_v53, %v1994_v50  ;;  %v2202_v26 = vld [vmem:[#allocation8 + $0x2ec] sm:$0xf]  ;;  %v1959_v31 = vor.u32 %v2182_v23, %v1958_v22  ;;  %v2145_v44 = vld [vmem:[#allocation8 + $0x124] sm:$0xf]  ;;  %v1816_v45 = vld [vmem:[#allocation8 + $0x12c] sm:$0xf0] }
  0x54   :  { %525 = vmatpush.bf16.msrb.mxu1 %v1467_v1  ;;  %v2188_v1 = vld [vmem:[#allocation8 + $0x278] sm:$0xf0]  ;;  %v1819_v46 = vor.u32 %v2145_v44, %v1816_v45  ;;  %v1924_v48 = vld [vmem:[#allocation8 + $0x204] sm:$0xf0]  ;;  %v1708_v53 = vld [vmem:[#allocation8 + $0x54] sm:$0xf0] }
  0x55   :  { %539 = vmatpush.bf16.msrb.mxu2 %v1471_v8  ;;  %v1779_v8 = vor.u32 %v2137_v3, %v1778_v2  ;;  %v2020_v50 = vld [vmem:[#allocation8 + $0x2c4] sm:$0xf0]  ;;  %v2142_v54 = vld [vmem:[#allocation8 + $0x10c] sm:$0xf]  ;;  %v1804_v56 = vld [vmem:[#allocation8 + $0x114] sm:$0xf0] }
  0x56   :  { %512 = vmatmul.bf16.vlgmr.msrb.gmra.mxu0 %v2379_v39  ;;  %1223 = vmatpush.bf16.msrb.mxu3 %v1671_v24  ;;  %v1807_v57 = vor.u32 %v2142_v54, %v1804_v56  ;;  %v1912_v59 = vld [vmem:[#allocation8 + $0x1ec] sm:$0xf0]  ;;  %v2193_v60 = vld [vmem:[#allocation8 + $0x2a4] sm:$0xf]  ;;  %v2139_v2 = vld [vmem:[#allocation8 + $0xf4] sm:$0xf] }
  0x57   :  { %1230 = vmatpush.bf16.msra.mxu0 %v1851_v0  ;;  %526 = vmatmul.bf16.vlgmr.msrb.gmra.mxu1 %v2379_v39  ;;  %v1982_v0 = vld [vmem:[#allocation8 + $0x270] sm:$0xf]  ;;  %v1996_v10 = vld [vmem:[#allocation8 + $0x294] sm:$0xf0]  ;;  %v1888_v19 = vld [vmem:[#allocation8 + $0x1bc] sm:$0xf0] }
  0x58   :  { %1244 = vmatpush.bf16.msra.mxu1 %v1947_v6  ;;  %540 = vmatmul.bf16.vlgmr.msrb.gmra.mxu2 %v2379_v39  ;;  %v2007_v39 = vor.u32 %v2194_v42, %v2006_v38  ;;  %v2161_v6 = vld [vmem:[#allocation8 + $0x1a0] sm:$0xf0]  ;;  %v1983_v7 = vor.u32 %v2188_v1, %v1982_v0  ;;  %v2148_v38 = vld [vmem:[#allocation8 + $0x13c] sm:$0xf]  ;;  %v2115_v0 = vld [vmem:[#allocation8 + $0x34] sm:$0xf] }
  0x59   :  { %1258 = vmatpush.bf16.msra.mxu2 %v2043_v11  ;;  %v1766_v11 = vld [vmem:[#allocation8 + $0xc0] sm:$0xf]  ;;  %v1875_v14 = vor.u32 %v2161_v6, %v1874_v5  ;;  %v2166_v6 = vld [vmem:[#allocation8 + $0x1cc] sm:$0xf]  ;;  %v2187_v20 = vld [vmem:[#allocation8 + $0x274] sm:$0xf] }
  0x5a   :  { %1272 = vmatpush.bf16.msra.mxu3 %v1759_v27  ;;  %v2044_v27 = vld [vmem:[#allocation8 + $0x2f4] sm:$0xf0]  ;;  %v1696_v1 = vld [vmem:[#allocation8 + $0x3c] sm:$0xf0]  ;;  %v546_v44 = vld [vmem:[#allocation7] sm:$0xf] }
  0x5b   :  { %1231 = vmatpush.bf16.msra.mxu0 %v1839_v15  ;;  %v1852_v15 = vld [vmem:[#allocation8 + $0x174] sm:$0xf0]  ;;  %v1699_v3 = vor.u32 %v2115_v0, %v1696_v1  ;;  %v1984_v22 = vld [vmem:[#allocation8 + $0x27c] sm:$0xf0]  ;;  %v1762_v54 = vld [vmem:[#allocation8 + $0xb0] sm:$0xf] }
  0x5c   :  { %1245 = vmatpush.bf16.msra.mxu1 %v1935_v21  ;;  %v1767_v21 = vor.u32 %v2134_v12, %v1766_v11  ;;  %v1855_v24 = vor.u32 %v2154_v13, %v1852_v15  ;;  %v2112_v12 = vld [vmem:[#allocation8 + $0x1c] sm:$0xf]  ;;  %v1684_v13 = vld [vmem:[#allocation8 + $0x24] sm:$0xf0]  ;;  %v1987_v23 = vor.u32 %v2187_v20, %v1984_v22  ;;  %v2126_v22 = vld [vmem:[#allocation8 + $0x88] sm:$0xf0] }
  0x5d   :  { %1259 = vmatpush.bf16.msra.mxu2 %v2031_v25  ;;  %v1863_v25 = vor.u32 %v2158_v17, %v1862_v16  ;;  %v1687_v15 = vor.u32 %v2112_v12, %v1684_v13  ;;  %v1780_v16 = vld [vmem:[#allocation8 + $0xe4] sm:$0xf0]  ;;  %v2204_v20 = vld [vmem:[#allocation8 + $0x2f8] sm:$0xf0] }
  0x5e   :  { %1273 = vmatpush.bf16.msra.mxu3 %v1747_v40  ;;  %v1828_v40 = vld [vmem:[#allocation8 + $0x144] sm:$0xf0] }
  0x5f   :  { %1232 = vmatpush.bf16.msra.mxu0 %v1827_v28  ;;  %v2151_v28 = vld [vmem:[#allocation8 + $0x154] sm:$0xf]  ;;  %v1831_v43 = vor.u32 %v2148_v38, %v1828_v40  ;;  %v2181_v40 = vld [vmem:[#allocation8 + $0x244] sm:$0xf] }
  0x60   :  { %1246 = vmatpush.bf16.msra.mxu1 %v1923_v34  ;;  %v2047_v34 = vor.u32 %v2202_v26, %v2044_v27  ;;  %v1843_v35 = vor.u32 %v2151_v28, %v1840_v29  ;;  %v2133_v26 = vld [vmem:[#allocation8 + $0xc4] sm:$0xf]  ;;  %v1768_v28 = vld [vmem:[#allocation8 + $0xcc] sm:$0xf0] }
  0x61   :  { %1260 = vmatpush.bf16.msra.mxu2 %v2019_v37  ;;  %v2032_v37 = vld [vmem:[#allocation8 + $0x2dc] sm:$0xf0]  ;;  %v1771_v29 = vor.u32 %v2133_v26, %v1768_v28  ;;  %v2150_v26 = vld [vmem:[#allocation8 + $0x148] sm:$0xf0] }
  0x62   :  { %1274 = vmatpush.bf16.msra.mxu3 %v1735_v51  ;;  %v2035_v42 = vor.u32 %v2199_v36, %v2032_v37  ;;  %v2157_v36 = vld [vmem:[#allocation8 + $0x184] sm:$0xf]  ;;  %v1864_v37 = vld [vmem:[#allocation8 + $0x18c] sm:$0xf0] }
  0x63   :  { %1233 = vmatpush.bf16.msra.mxu0 %v1815_v41  ;;  %v1939_v41 = vor.u32 %v2175_v32, %v1936_v33  ;;  %v2184_v32 = vld [vmem:[#allocation8 + $0x25c] sm:$0xf]  ;;  %v1972_v33 = vld [vmem:[#allocation8 + $0x264] sm:$0xf0]  ;;  %v1867_v38 = vor.u32 %v2157_v36, %v1864_v37 }
  0x64   :  { %1247 = vmatpush.bf16.msra.mxu1 %v1911_v47  ;;  %v2172_v47 = vld [vmem:[#allocation8 + $0x1fc] sm:$0xf] }
  0x65   :  { %1261 = vmatpush.bf16.msra.mxu2 %v2007_v39  ;;  %v1927_v49 = vor.u32 %v2172_v47, %v1924_v48  ;;  %v2196_v39 = vld [vmem:[#allocation8 + $0x2bc] sm:$0xf]  ;;  %v548_v47 = vperm.slane %v546_v44, 0 }
  0x66   :  { %1275 = vmatpush.bf16.msra.mxu3 %v1723_v62  ;;  %v2023_v51 = vor.u32 %v2196_v39, %v2020_v50  ;;  %v2008_v62 = vld [vmem:[#allocation8 + $0x2ac] sm:$0xf0] }
  0x67   :  { %1234 = vmatpush.bf16.msra.mxu0 %v1803_v52  ;;  %v2118_v52 = vld [vmem:[#allocation8 + $0x4c] sm:$0xf] }
  0x68   :  { %1248 = vmatpush.bf16.msra.mxu1 %v1899_v58  ;;  %v1711_v55 = vor.u32 %v2118_v52, %v1708_v53  ;;  %v2169_v58 = vld [vmem:[#allocation8 + $0x1e4] sm:$0xf] }
  0x69   :  { %1262 = vmatpush.bf16.msra.mxu2 %v1995_v61  ;;  %v1915_v61 = vor.u32 %v2169_v58, %v1912_v59  ;;  %v1858_v59 = vld [vmem:[#allocation8 + $0x170] sm:$0xf] }
  0x6a   :  { %1276 = vmatpush.bf16.msra.mxu3 %v1711_v55  ;;  %v2132_v55 = vld [vmem:[#allocation8 + $0xb8] sm:$0xf0] }
  0x6b   :  { %1235 = vmatpush.bf16.msra.mxu0 %v1791_v63  ;;  %v2011_v63 = vor.u32 %v2193_v60, %v2008_v62  ;;  %v2156_v60 = vld [vmem:[#allocation8 + $0x178] sm:$0xf0]  ;;  %v551_v62 = vperm.slane %v546_v44, 3  ;;  %v1763_v1 = vor.u32 %v2132_v55, %v1762_v54 }
  0x6c   :  { %1249 = vmatpush.bf16.msra.mxu1 %v1887_v4  ;;  %v1792_v4 = vld [vmem:[#allocation8 + $0xfc] sm:$0xf0]  ;;  %v2144_v54 = vld [vmem:[#allocation8 + $0x118] sm:$0xf0] }
  0x6d   :  { %1263 = vmatpush.bf16.msra.mxu2 %v1983_v7  ;;  %v1795_v5 = vor.u32 %v2139_v2, %v1792_v4  ;;  %v1900_v7 = vld [vmem:[#allocation8 + $0x1d4] sm:$0xf0] }
  0x6e   :  { %1277 = vmatpush.bf16.msra.mxu3 %v1699_v3  ;;  %v1903_v9 = vor.u32 %v2166_v6, %v1900_v7  ;;  %v1859_v3 = vor.u32 %v2156_v60, %v1858_v59  ;;  %v1750_v4 = vld [vmem:[#allocation8 + $0x98] sm:$0xf] }
  0x6f   :  { %1236 = vmatpush.bf16.msra.mxu0 %v1779_v8  ;;  %v2190_v8 = vld [vmem:[#allocation8 + $0x28c] sm:$0xf] }
  0x70   :  { %1250 = vmatpush.bf16.msra.mxu1 %v1875_v14  ;;  %v1999_v11 = vor.u32 %v2190_v8, %v1996_v10  ;;  %v2136_v14 = vld [vmem:[#allocation8 + $0xdc] sm:$0xf]  ;;  %v1846_v8 = vld [vmem:[#allocation8 + $0x158] sm:$0xf] }
  0x71   :  { %1264 = vmatpush.bf16.msra.mxu2 %v1971_v18  ;;  %v1783_v17 = vor.u32 %v2136_v14, %v1780_v16  ;;  %v2163_v18 = vld [vmem:[#allocation8 + $0x1b4] sm:$0xf]  ;;  %v2180_v16 = vld [vmem:[#allocation8 + $0x238] sm:$0xf0] }
  0x72   :  { %1278 = vmatpush.bf16.msra.mxu3 %v1687_v15  ;;  %v1954_v15 = vld [vmem:[#allocation8 + $0x230] sm:$0xf] }
  0x73   :  { %1237 = vmatpush.bf16.msra.mxu0 %v1767_v21  ;;  %v1891_v21 = vor.u32 %v2163_v18, %v1888_v19 }
  0x74   :  { %1251 = vmatpush.bf16.msra.mxu1 %v1863_v25  ;;  %v1672_v25 = vld [vmem:[#allocation8 + $0xc] sm:$0xf0] }
  0x75   :  { %1265 = vmatpush.bf16.msra.mxu2 %v1959_v31  ;;  %v1876_v31 = vld [vmem:[#allocation8 + $0x1a4] sm:$0xf0] }
  0x77   :  { %1286 = vmatpush.bf16.msrb.mxu0 %v1855_v24  ;;  %v2109_v24 = vld [vmem:[#allocation8 + $0x4] sm:$0xf] }
  0x78   :  { %1300 = vmatpush.bf16.msrb.mxu1 %v1951_v30  ;;  %v1675_v27 = vor.u32 %v2109_v24, %v1672_v25  ;;  %v2160_v30 = vld [vmem:[#allocation8 + $0x19c] sm:$0xf]  ;;  %v1834_v25 = vld [vmem:[#allocation8 + $0x140] sm:$0xf] }
  0x79   :  { %1314 = vmatpush.bf16.msrb.mxu2 %v2047_v34  ;;  %v1879_v34 = vor.u32 %v2160_v30, %v1876_v31  ;;  %v1835_v37 = vor.u32 %v2150_v26, %v1834_v25  ;;  %v1678_v25 = vld [vmem:[#allocation8 + $0x8] sm:$0xf]  ;;  %v2111_v26 = vld [vmem:[#allocation8 + $0x10] sm:$0xf0] }
  0x7a   :  { %1279 = vmatpush.bf16.msra.mxu3 %v1675_v27 }
  0x7b   :  { %1287 = vmatpush.bf16.msrb.mxu0 %v1843_v35  ;;  %v1975_v35 = vor.u32 %v2184_v32, %v1972_v33  ;;  %v1942_v33 = vld [vmem:[#allocation8 + $0x218] sm:$0xf] }
  0x7c   :  { %1301 = vmatpush.bf16.msrb.mxu1 %v1939_v41  ;;  %v1960_v41 = vld [vmem:[#allocation8 + $0x24c] sm:$0xf0] }
  0x7d   :  { %1315 = vmatpush.bf16.msrb.mxu2 %v2035_v42  ;;  %v1963_v42 = vor.u32 %v2181_v40, %v1960_v41  ;;  %v1726_v40 = vld [vmem:[#allocation8 + $0x68] sm:$0xf]  ;;  %v2123_v41 = vld [vmem:[#allocation8 + $0x70] sm:$0xf0] }
  0x7f   :  { %1288 = vmatpush.bf16.msrb.mxu0 %v1831_v43 }
  0x80   :  { %1302 = vmatpush.bf16.msrb.mxu1 %v1927_v49 }
  0x81   :  { %1316 = vmatpush.bf16.msrb.mxu2 %v2023_v51 }
  0x83   :  { %1289 = vmatpush.bf16.msrb.mxu0 %v1819_v46  ;;  %v549_v46 = vperm.slane %v546_v44, 1 }
  0x84   :  { %1303 = vmatpush.bf16.msrb.mxu1 %v1915_v61 }
  0x85   :  { %1317 = vmatpush.bf16.msrb.mxu2 %v2011_v63 }
  0x87   :  { %1290 = vmatpush.bf16.msrb.mxu0 %v1807_v57  ;;  %v550_v57 = vperm.slane %v546_v44, 2 }
  0x88   :  { %1304 = vmatpush.bf16.msrb.mxu1 %v1903_v9  ;;  %v2153_v9 = vld [vmem:[#allocation8 + $0x160] sm:$0xf0] }
  0x89   :  { %1318 = vmatpush.bf16.msrb.mxu2 %v1999_v11  ;;  %v1847_v19 = vor.u32 %v2153_v9, %v1846_v8  ;;  %v2168_v8 = vld [vmem:[#allocation8 + $0x1d8] sm:$0xf0] }
  0x8b   :  { %1291 = vmatpush.bf16.msrb.mxu0 %v1795_v5  ;;  %v2129_v5 = vld [vmem:[#allocation8 + $0xa0] sm:$0xf0] }
  0x8c   :  { %1305 = vmatpush.bf16.msrb.mxu1 %v1891_v21  ;;  %v1751_v14 = vor.u32 %v2129_v5, %v1750_v4  ;;  %v1738_v21 = vld [vmem:[#allocation8 + $0x80] sm:$0xf] }
  0x8d   :  { %1319 = vmatpush.bf16.msrb.mxu2 %v1987_v23  ;;  %v1739_v32 = vor.u32 %v2126_v22, %v1738_v21 }
  0x8f   :  { %1292 = vmatpush.bf16.msrb.mxu0 %v1783_v17  ;;  %v2050_v17 = vld [vmem:[#allocation8 + $0x2f0] sm:$0xf] }
  0x90   :  { %1306 = vmatpush.bf16.msrb.mxu1 %v1879_v34  ;;  %v2051_v31 = vor.u32 %v2204_v20, %v2050_v17  ;;  %v2177_v34 = vld [vmem:[#allocation8 + $0x220] sm:$0xf0] }
  0x91   :  { %1320 = vmatpush.bf16.msrb.mxu2 %v1975_v35  ;;  %v2038_v35 = vld [vmem:[#allocation8 + $0x2d8] sm:$0xf]  ;;  %v1943_v44 = vor.u32 %v2177_v34, %v1942_v33  ;;  %v2165_v20 = vld [vmem:[#allocation8 + $0x1c0] sm:$0xf0]  ;;  %v2162_v33 = vld [vmem:[#allocation8 + $0x1a8] sm:$0xf0]  ;;  %v1679_v34 = vor.u32 %v2111_v26, %v1678_v25 }
  0x93   :  { %1293 = vmatpush.bf16.msrb.mxu0 %v1771_v29  ;;  %v1955_v29 = vor.u32 %v2180_v16, %v1954_v15  ;;  %v1786_v15 = vld [vmem:[#allocation8 + $0xe0] sm:$0xf]  ;;  %v2138_v16 = vld [vmem:[#allocation8 + $0xe8] sm:$0xf0] }
  0x94   :  { %1307 = vmatpush.bf16.msrb.mxu1 %v1867_v38  ;;  %v2201_v38 = vld [vmem:[#allocation8 + $0x2e0] sm:$0xf0]  ;;  %v1787_v22 = vor.u32 %v2138_v16, %v1786_v15 }
  0x95   :  { %1321 = vmatpush.bf16.msrb.mxu2 %v1963_v42  ;;  %v1822_v42 = vld [vmem:[#allocation8 + $0x128] sm:$0xf] }
  0xb3   :  { %v457_v43 = vpop.f32.mrf.mxu0 }
  0xb4   :  { %v471_v45 = vpop.f32.mrf.mxu1  ;;  %v556_v49 = vadd.f32 %v548_v47, %v457_v43  ;;  %v2147_v43 = vld [vmem:[#allocation8 + $0x130] sm:$0xf0] }
  0xb5   :  { %v557_v48 = vadd.f32 %v549_v46, %v471_v45  ;;  %v2039_v45 = vor.u32 %v2201_v38, %v2038_v35  ;;  %v2186_v38 = vld [vmem:[#allocation8 + $0x268] sm:$0xf0] }
  0xb6   :  { %v564_v61 = vmax.f32 %v556_v49, 0.0  ;;  %v1823_v49 = vor.u32 %v2147_v43, %v1822_v42  ;;  %v1870_v42 = vld [vmem:[#allocation8 + $0x188] sm:$0xf]  ;;  %v2159_v43 = vld [vmem:[#allocation8 + $0x190] sm:$0xf0] }
  0xb7   :  { %v565_v56 = vmax.f32 %v557_v48, 0.0  ;;  %v2174_v48 = vld [vmem:[#allocation8 + $0x208] sm:$0xf0] }
  0xbb   :  { %v485_v39 = vpop.f32.mrf.mxu2  ;;  %v459_v51 = vpop.f32.mrf.mxu0 }
  0xbc   :  { %v499_v50 = vpop.f32.mrf.mxu3  ;;  %v560_v52 = vadd.f32 %v548_v47, %v459_v51  ;;  %v473_v53 = vpop.f32.mrf.mxu1  ;;  %v558_v6 = vadd.f32 %v550_v57, %v485_v39  ;;  %v1930_v47 = vld [vmem:[#allocation8 + $0x200] sm:$0xf]  ;;  %v1714_v51 = vld [vmem:[#allocation8 + $0x50] sm:$0xf] }
  0xbd   :  { %v561_v58 = vadd.f32 %v549_v46, %v473_v53  ;;  %v559_v10 = vadd.f32 %v551_v62, %v499_v50  ;;  %v1727_v46 = vor.u32 %v2123_v41, %v1726_v40  ;;  %v2026_v39 = vld [vmem:[#allocation8 + $0x2c0] sm:$0xf]  ;;  %v2198_v50 = vld [vmem:[#allocation8 + $0x2c8] sm:$0xf0]  ;;  %v1810_v53 = vld [vmem:[#allocation8 + $0x110] sm:$0xf]  ;;  %v1931_v55 = vor.u32 %v2174_v48, %v1930_v47 }
  0xbe   :  { %v568_v63 = vmax.f32 %v560_v52, 0.0  ;;  %v566_v23 = vmax.f32 %v558_v6, 0.0  ;;  %v2120_v52 = vld [vmem:[#allocation8 + $0x58] sm:$0xf0]  ;;  %v1811_v60 = vor.u32 %v2144_v54, %v1810_v53  ;;  %v1906_v6 = vld [vmem:[#allocation8 + $0x1d0] sm:$0xf] }
  0xbf   :  { %v569_v0 = vmax.f32 %v561_v58, 0.0  ;;  %v567_v27 = vmax.f32 %v559_v10, 0.0  ;;  %v2171_v58 = vld [vmem:[#allocation8 + $0x1f0] sm:$0xf0]  ;;  %v1715_v59 = vor.u32 %v2120_v52, %v1714_v51  ;;  %v1907_v17 = vor.u32 %v2168_v8, %v1906_v6 }
  0xc0   :  { %v2388_v2 = vpack.c.bf16 %v568_v63, %v564_v61  ;;  %v2014_v61 = vld [vmem:[#allocation8 + $0x2a8] sm:$0xf]  ;;  %v1702_v63 = vld [vmem:[#allocation8 + $0x38] sm:$0xf] }
  0xc1   :  { %v2390_v7 = vpack.c.bf16 %v569_v0, %v565_v56  ;;  %v2027_v56 = vor.u32 %v2198_v50, %v2026_v39  ;;  %v2117_v0 = vld [vmem:[#allocation8 + $0x40] sm:$0xf0] }
  0xc2   :  { %1224 = vmatmul.bf16.vlgmr.msrb.gmra.mxu3 %v2388_v2  ;;  %v1703_v9 = vor.u32 %v2117_v0, %v1702_v63 }
  0xc3   :  { %v487_v11 = vpop.f32.mrf.mxu2  ;;  %1238 = vmatmul.bf16.vlgmr.msra.gmra.mxu0 %v2390_v7  ;;  %1328 = vmatpush.bf16.msrb.mxu3 %v1763_v1  ;;  %v1798_v1 = vld [vmem:[#allocation8 + $0xf8] sm:$0xf] }
  0xc4   :  { %v562_v12 = vadd.f32 %v550_v57, %v487_v11  ;;  %v501_v13 = vpop.f32.mrf.mxu3  ;;  %1342 = vmatpush.bf16.msra.mxu0 %v1859_v3  ;;  %v1918_v57 = vld [vmem:[#allocation8 + $0x1e8] sm:$0xf]  ;;  %v2141_v3 = vld [vmem:[#allocation8 + $0x100] sm:$0xf0]  ;;  %v2002_v11 = vld [vmem:[#allocation8 + $0x290] sm:$0xf] }
  0xc5   :  { %v563_v18 = vadd.f32 %v551_v62, %v501_v13  ;;  %v2195_v62 = vld [vmem:[#allocation8 + $0x2b0] sm:$0xf0]  ;;  %v1919_v4 = vor.u32 %v2171_v58, %v1918_v57  ;;  %v1799_v10 = vor.u32 %v2141_v3, %v1798_v1  ;;  %v1690_v13 = vld [vmem:[#allocation8 + $0x20] sm:$0xf] }
  0xc6   :  { %v570_v24 = vmax.f32 %v562_v12, 0.0  ;;  %v2015_v5 = vor.u32 %v2195_v62, %v2014_v61  ;;  %v2192_v12 = vld [vmem:[#allocation8 + $0x298] sm:$0xf0] }
  0xc7   :  { %v571_v28 = vmax.f32 %v563_v18, 0.0  ;;  %1329 = vmatpush.bf16.msrb.mxu3 %v1751_v14  ;;  %v2114_v14 = vld [vmem:[#allocation8 + $0x28] sm:$0xf0]  ;;  %v2003_v18 = vor.u32 %v2192_v12, %v2002_v11 }
  0xc8   :  { %v2394_v30 = vpack.c.bf16 %v570_v24, %v566_v23  ;;  %1343 = vmatpush.bf16.msra.mxu0 %v1847_v19  ;;  %v1894_v19 = vld [vmem:[#allocation8 + $0x1b8] sm:$0xf]  ;;  %v1691_v21 = vor.u32 %v2114_v14, %v1690_v13  ;;  %v2189_v24 = vld [vmem:[#allocation8 + $0x280] sm:$0xf0] }
  0xc9   :  { %v2396_v36 = vpack.c.bf16 %v571_v28, %v567_v27  ;;  %v1990_v23 = vld [vmem:[#allocation8 + $0x278] sm:$0xf]  ;;  %v1774_v27 = vld [vmem:[#allocation8 + $0xc8] sm:$0xf]  ;;  %v2135_v28 = vld [vmem:[#allocation8 + $0xd0] sm:$0xf0] }
  0xca   :  { %1252 = vmatmul.bf16.vlgmr.msra.gmra.mxu1 %v2394_v30  ;;  %v1775_v35 = vor.u32 %v2135_v28, %v1774_v27  ;;  %v1404_v27 = vld [vmem:[%s2428_s5] sm:$0x7] }
  0xcb   :  { %1266 = vmatmul.bf16.vlgmr.msra.gmra.mxu2 %v2396_v36  ;;  %1356 = vmatpush.bf16.msra.mxu1 %v1955_v29  ;;  %v1895_v29 = vor.u32 %v2165_v20, %v1894_v19 }
  0xcc   :  { %1370 = vmatpush.bf16.msra.mxu2 %v2051_v31  ;;  %1330 = vmatpush.bf16.msrb.mxu3 %v1739_v32  ;;  %v1991_v31 = vor.u32 %v2189_v24, %v1990_v23  ;;  %v1882_v32 = vld [vmem:[#allocation8 + $0x1a0] sm:$0xf] }
  0xcd   :  { %1344 = vmatpush.bf16.msra.mxu0 %v1835_v37  ;;  %v1978_v37 = vld [vmem:[#allocation8 + $0x260] sm:$0xf]  ;;  %v1883_v40 = vor.u32 %v2162_v33, %v1882_v32  ;;  %v1407_v32 = vperm.slane %v1404_v27, 1 }
  0xce   :  { %v1979_v41 = vor.u32 %v2186_v38, %v1978_v37  ;;  %v1406_v38 = vperm.slane %v1404_v27, 0 }
  0xcf   :  { %1357 = vmatpush.bf16.msra.mxu1 %v1943_v44  ;;  %v1966_v44 = vld [vmem:[#allocation8 + $0x248] sm:$0xf] }
  0xd0   :  { %1371 = vmatpush.bf16.msra.mxu2 %v2039_v45  ;;  %1331 = vmatpush.bf16.msrb.mxu3 %v1727_v46  ;;  %v2183_v45 = vld [vmem:[#allocation8 + $0x250] sm:$0xf0]  ;;  %v1871_v46 = vor.u32 %v2159_v43, %v1870_v42 }
  0xd1   :  { %1345 = vmatpush.bf16.msra.mxu0 %v1823_v49  ;;  %v1967_v47 = vor.u32 %v2183_v45, %v1966_v44 }
  0xd2   :  { %1280 = vmatmul.bf16.vlgmr.msra.gmra.mxu3 %v2388_v2 }
  0xd3   :  { %1358 = vmatpush.bf16.msra.mxu1 %v1931_v55  ;;  %1294 = vmatmul.bf16.vlgmr.msrb.gmra.mxu0 %v2390_v7  ;;  %v513_v48 = vpop.f32.mrf.mxu0 }
  0xd4   :  { %1372 = vmatpush.bf16.msra.mxu2 %v2027_v56  ;;  %1332 = vmatpush.bf16.msrb.mxu3 %v1715_v59  ;;  %v527_v49 = vpop.f32.mrf.mxu1 }
  0xd5   :  { %1346 = vmatpush.bf16.msra.mxu0 %v1811_v60 }
  0xd7   :  { %1359 = vmatpush.bf16.msra.mxu1 %v1919_v4 }
  0xd8   :  { %1373 = vmatpush.bf16.msra.mxu2 %v2015_v5  ;;  %1333 = vmatpush.bf16.msrb.mxu3 %v1703_v9 }
  0xd9   :  { %1347 = vmatpush.bf16.msra.mxu0 %v1799_v10  ;;  %v1384_v10 = vld [vmem:[%s2427_s4] sm:$0x7] }
  0xda   :  { %1308 = vmatmul.bf16.vlgmr.msrb.gmra.mxu1 %v2394_v30  ;;  %v1387_v12 = vperm.slane %v1384_v10, 1  ;;  %v1386_v16 = vperm.slane %v1384_v10, 0  ;;  %v1388_v33 = vperm.slane %v1384_v10, 2 }
  0xdb   :  { %1322 = vmatmul.bf16.vlgmr.msrb.gmra.mxu2 %v2396_v36  ;;  %1360 = vmatpush.bf16.msra.mxu1 %v1907_v17  ;;  %v515_v39 = vpop.f32.mrf.mxu0  ;;  %v541_v50 = vpop.f32.mrf.mxu2 }
  0xdc   :  { %1374 = vmatpush.bf16.msra.mxu2 %v2003_v18  ;;  %1334 = vmatpush.bf16.msrb.mxu3 %v1691_v21  ;;  %v529_v51 = vpop.f32.mrf.mxu1 }
  0xdd   :  { %1348 = vmatpush.bf16.msra.mxu0 %v1787_v22 }
  0xdf   :  { %1361 = vmatpush.bf16.msra.mxu1 %v1895_v29 }
  0xe0   :  { %1375 = vmatpush.bf16.msra.mxu2 %v1991_v31  ;;  %1335 = vmatpush.bf16.msrb.mxu3 %v1679_v34 }
  0xe1   :  { %1349 = vmatpush.bf16.msra.mxu0 %v1775_v35 }
  0xe3   :  { %1362 = vmatpush.bf16.msra.mxu1 %v1883_v40  ;;  %1336 = vmatmul.bf16.vlgmr.msrb.gmra.mxu3 %v2388_v2  ;;  %v543_v53 = vpop.f32.mrf.mxu2 }
  0xe4   :  { %1376 = vmatpush.bf16.msra.mxu2 %v1979_v41  ;;  %1350 = vmatmul.bf16.vlgmr.msra.gmra.mxu0 %v2390_v7 }
  0xe7   :  { %1363 = vmatpush.bf16.msra.mxu1 %v1871_v46  ;;  %v1408_v46 = vperm.slane %v1404_v27, 2 }
  0xe8   :  { %1377 = vmatpush.bf16.msra.mxu2 %v1967_v47 }
  0xea   :  { %1364 = vmatmul.bf16.vlgmr.msra.gmra.mxu1 %v2394_v30 }
  0xeb   :  { %1378 = vmatmul.bf16.vlgmr.msra.gmra.mxu2 %v2396_v36 }
 0x140   :  { %v1239_v52 = vpop.f32.mrf.mxu0 }
 0x145   :  { %v1225_v54 = vpop.f32.mrf.mxu3 }
 0x146   :  { %v1226_v62 = vadd.f32 %v1225_v54, %v513_v48 }
 0x147   :  { %v1253_v55 = vpop.f32.mrf.mxu1 }
 0x148   :  { %v1241_v56 = vpop.f32.mrf.mxu0  ;;  %v1240_v3 = vadd.f32 %v1239_v52, %v1226_v62 }
 0x14a   :  { %v1254_v8 = vadd.f32 %v1253_v55, %v1240_v3 }
 0x14d   :  { %v1227_v57 = vpop.f32.mrf.mxu3 }
 0x14e   :  { %v1267_v2 = vpop.f32.mrf.mxu2  ;;  %v1228_v9 = vadd.f32 %v1227_v57, %v515_v39 }
 0x14f   :  { %v1255_v58 = vpop.f32.mrf.mxu1  ;;  %v1268_v15 = vadd.f32 %v1267_v2, %v1254_v8 }
 0x150   :  { %v1295_v7 = vpop.f32.mrf.mxu0  ;;  %v1242_v17 = vadd.f32 %v1241_v56, %v1228_v9 }
 0x151   :  { %v1392_v25 = vadd.f32 %v1386_v16, %v1268_v15 }
 0x152   :  { %v1256_v26 = vadd.f32 %v1255_v58, %v1242_v17 }
 0x153   :  { %v1398_v35 = vmax.f32 %v1392_v25, 0.0 }
 0x155   :  { %v1281_v60 = vpop.f32.mrf.mxu3 }
 0x156   :  { %v1269_v59 = vpop.f32.mrf.mxu2  ;;  %v1282_v30 = vadd.f32 %v1281_v60, %v527_v49 }
 0x157   :  { %v1309_v61 = vpop.f32.mrf.mxu1  ;;  %v1270_v37 = vadd.f32 %v1269_v59, %v1256_v26 }
 0x158   :  { %v1296_v36 = vadd.f32 %v1295_v7, %v1282_v30  ;;  %v1297_v63 = vpop.f32.mrf.mxu0 }
 0x159   :  { %v1395_v49 = vadd.f32 %v1386_v16, %v1270_v37 }
 0x15a   :  { %v1310_v5 = vadd.f32 %v1309_v61, %v1296_v36 }
 0x15b   :  { %v1401_v57 = vmax.f32 %v1395_v49, 0.0 }
 0x15d   :  { %v1283_v1 = vpop.f32.mrf.mxu3  ;;  %v1415_v60 = vmul.f32 %v1406_v38, %v1401_v57 }
 0x15e   :  { %v1323_v0 = vpop.f32.mrf.mxu2  ;;  %v1284_v6 = vadd.f32 %v1283_v1, %v529_v51  ;;  %v1412_v51 = vmul.f32 %v1406_v38, %v1398_v35 }
 0x15f   :  { %v1311_v4 = vpop.f32.mrf.mxu1  ;;  %v1324_v11 = vadd.f32 %v1323_v0, %v1310_v5 }
 0x160   :  { %v1298_v13 = vadd.f32 %v1297_v63, %v1284_v6  ;;  %v1427_v63 = vstv %s2429_s6 }
 0x161   :  { %v1351_v18 = vpop.f32.mrf.mxu0  ;;  %v1393_v21 = vadd.f32 %v1387_v12, %v1324_v11 }
 0x162   :  { %v1312_v22 = vadd.f32 %v1311_v4, %v1298_v13 }
 0x163   :  { %v1399_v29 = vmax.f32 %v1393_v21, 0.0 }
 0x165   :  { %v1413_v47 = vmul.f32 %v1407_v32, %v1399_v29 }
 0x166   :  { %v1325_v14 = vpop.f32.mrf.mxu2  ;;  %v1337_v19 = vpop.f32.mrf.mxu3 }
 0x167   :  { %v1338_v20 = vadd.f32 %v1337_v19, %v541_v50  ;;  %v1365_v23 = vpop.f32.mrf.mxu1  ;;  %v1326_v31 = vadd.f32 %v1325_v14, %v1312_v22  ;;  %v1418_v56 = vadd.f32 %v1413_v47, %v1412_v51 }
 0x169   :  { %v1352_v24 = vadd.f32 %v1351_v18, %v1338_v20  ;;  %v1396_v43 = vadd.f32 %v1387_v12, %v1326_v31  ;;  %v1353_v44 = vpop.f32.mrf.mxu0 }
 0x16b   :  { %v1366_v28 = vadd.f32 %v1365_v23, %v1352_v24  ;;  %v1402_v54 = vmax.f32 %v1396_v43, 0.0 }
 0x16d   :  { %v1416_v59 = vmul.f32 %v1407_v32, %v1402_v54 }
 0x16e   :  { %v1379_v34 = vpop.f32.mrf.mxu2  ;;  %v1339_v41 = vpop.f32.mrf.mxu3 }
 0x16f   :  { %v1380_v40 = vadd.f32 %v1379_v34, %v1366_v28  ;;  %v1340_v42 = vadd.f32 %v1339_v41, %v543_v53  ;;  %v1367_v50 = vpop.f32.mrf.mxu1  ;;  %v1422_v62 = vadd.f32 %v1416_v59, %v1415_v60 }
 0x171   :  { %v1394_v45 = vadd.f32 %v1388_v33, %v1380_v40  ;;  %v1354_v48 = vadd.f32 %v1353_v44, %v1340_v42 }
 0x173   :  { %v1400_v39 = vmax.f32 %v1394_v45, 0.0  ;;  %v1368_v52 = vadd.f32 %v1367_v50, %v1354_v48 }
 0x175   :  { %v1414_v55 = vmul.f32 %v1408_v46, %v1400_v39 }
 0x176   :  { %v1381_v2 = vpop.f32.mrf.mxu2 }
 0x177   :  { %v1382_v58 = vadd.f32 %v1381_v2, %v1368_v52  ;;  %v1419_v7 = vadd.f32 %v1418_v56, %v1414_v55 }
 0x179   :  { %v1397_v53 = vadd.f32 %v1388_v33, %v1382_v58  ;;  %1420 = vadd.xlane.f32.xlu0 %v1419_v7 }
 0x17b   :  { %v1403_v61 = vmax.f32 %v1397_v53, 0.0 }
 0x17d   :  { %v1417_v30 = vmul.f32 %v1408_v46, %v1403_v61 }
 0x17f   :  { %v1423_v36 = vadd.f32 %v1422_v62, %v1417_v30 }
 0x181   :  { %1424 = vadd.xlane.f32.xlu0 %v1423_v36 }
 0x1ec   :  { %v1421_v0 = vpop.xlane.xlu0 %1420 }
 0x1ed   :  { %v1428_v1 = vadd.f32 %v1427_v63, %v1421_v0 }
 0x1ef   :  { %1431 = vst.msk [vmem:[%s2430_s7] sm:$0xff] %vm1430_vm0, %v1428_v1 }
 0x1f4   :  { %v1425_v3 = vpop.xlane.xlu0 %1424 }
 0x1f5   :  { %v1429_v4 = vadd.f32 %v1427_v63, %v1425_v3 }
 0x1f7   :  { %1432 = vst.msk [vmem:[%s2430_s7 + $0x8] sm:$0xff] %vm1430_vm0, %v1429_v4 }
 0x1f8   :  { %1437 = vsyncpa [#allocation4], 1 }
 0x1f9   :  { %1438 = vsyncpa [#allocation6], 1 }
 0x1fa   :  { %1439 = vsyncpa [#allocation9], 1 }

</bundles_post_ra>
